<compile_context>
chip_gen: v7x
topology: tpu7x:2x2x1
jax: 0.10.0
libtpu: 0.0.40
codegen_flags: <defaults>
</compile_context>

<pallas_src>
import functools

import jax
import jax.numpy as jnp
from jax.experimental import pallas as pl
from jax.experimental.pallas import tpu as pltpu

POS_WEIGHT = 1.0
EPS = 1e-6


def _round_up(x, m):
    return ((x + m - 1) // m) * m


def _mask_bce_rowsum_kernel(logits_ref, target_ref, out_ref, *,
                            hw, hw_tile, mask_lanes, hard_labels):
    k = pl.program_id(1)

    @pl.when(k == 0)
    def _():
        out_ref[...] = jnp.zeros_like(out_ref)

    x = logits_ref[...].astype(jnp.float32)
    t = target_ref[...].astype(jnp.float32)

    if hard_labels:
        # Targets guaranteed 0/1: one transcendental per element instead of two.
        loss = jnp.log(jnp.where(t > 0.5, x + EPS, 1.0 - x - EPS))
    else:
        # General (soft-label) BCE body; -pos_weight is hoisted to the wrapper.
        loss = t * jnp.log(x + EPS) + (1.0 - t) * jnp.log(1.0 - x - EPS)

    if mask_lanes:
        # Zero out HW-padding lanes in the last HW tile.
        lane = jax.lax.broadcasted_iota(jnp.int32, loss.shape, 1) + k * hw_tile
        loss = jnp.where(lane < hw, loss, 0.0)

    # Per-(b, c)-row partial sum over this HW tile, accumulated across the
    # "arbitrary" HW grid axis in the VMEM-resident output block.
    out_ref[...] += jnp.sum(loss, axis=1, keepdims=True)


@functools.partial(jax.jit, static_argnames=("hard_labels",))
def mask_bce_loss_sum(logits, target, mask, *, hard_labels=False):
    """MaskBCELoss with reduction='sum'.

    logits, target: (B, C, H, W);  mask: (B, C).  Returns an f32 scalar.
    """
    B, C, H, W = logits.shape
    BC = B * C
    HW = H * W

    itemsize = jnp.dtype(logits.dtype).itemsize

    # Lane-dense HW tile: multiple of 128, capped at 2048 lanes.
    hw_tile = min(2048, _round_up(HW, 128))
    # Row tile: multiple of 8, sized so one input block is ~2 MiB.
    target_block_bytes = 2 * 1024 * 1024
    max_rows = max(8, (target_block_bytes // (hw_tile * itemsize)) // 8 * 8)
    row_tile = min(_round_up(BC, 8), max_rows, 256)

    BC_pad = _round_up(BC, row_tile)
    HW_pad = _round_up(HW, hw_tile)

    logits2d = logits.reshape(BC, HW)
    target2d = target.reshape(BC, HW)

    pad_rows = BC_pad - BC
    pad_cols = HW_pad - HW
    if pad_rows or pad_cols:
        # Pad with values whose logs are finite; padded lanes are zeroed by the
        # in-kernel lane mask, padded rows are dropped before the final sum.
        logits2d = jnp.pad(logits2d, ((0, pad_rows), (0, pad_cols)),
                           constant_values=0.5)
        target2d = jnp.pad(target2d, ((0, pad_rows), (0, pad_cols)),
                           constant_values=0.0)

    grid = (BC_pad // row_tile, HW_pad // hw_tile)

    kernel = functools.partial(
        _mask_bce_rowsum_kernel,
        hw=HW,
        hw_tile=hw_tile,
        mask_lanes=(HW_pad != HW),
        hard_labels=hard_labels,
    )

    n_elem = BC_pad * HW_pad
    cost = pl.CostEstimate(
        flops=6 * n_elem,
        transcendentals=(1 if hard_labels else 2) * n_elem,
        bytes_accessed=2 * n_elem * itemsize + BC_pad * 4,
    )

    row_sums = pl.pallas_call(
        kernel,
        out_shape=jax.ShapeDtypeStruct((BC_pad, 1), jnp.float32),
        grid_spec=pltpu.PrefetchScalarGridSpec(
            num_scalar_prefetch=0,
            grid=grid,
            in_specs=[
                pl.BlockSpec((row_tile, hw_tile), lambda i, k: (i, k)),
                pl.BlockSpec((row_tile, hw_tile), lambda i, k: (i, k)),
            ],
            out_specs=pl.BlockSpec((row_tile, 1), lambda i, k: (i, 0)),
        ),
        compiler_params=pltpu.CompilerParams(
            dimension_semantics=("parallel", "arbitrary"),
            vmem_limit_bytes=32 * 1024 * 1024,
        ),
        cost_estimate=cost,
    )(logits2d, target2d)

    # Mask, sign and pos_weight applied once outside the kernel (the spatial
    # reduction is linear); padded rows are excluded by slicing to BC.
    mask_f32 = mask.reshape(BC).astype(jnp.float32)
    return -POS_WEIGHT * jnp.sum(row_sums[:BC, 0] * mask_f32)


def _reference(logits, target, mask):
    loss = -POS_WEIGHT * (
        target * jnp.log(logits + EPS)
        + (1.0 - target) * jnp.log(1.0 - logits - EPS)
    )
    return jnp.sum(jnp.sum(loss, axis=(2, 3)) * mask)


if __name__ == "__main__":
    key = jax.random.PRNGKey(0)
    k1, k2, k3 = jax.random.split(key, 3)

    B, C, H, W = 2, 4, 16, 16
    # "logits" are probabilities in (eps, 1-eps), as the BCE formula assumes
    # (no sigmoid in the PyTorch module either).
    logits = jax.random.uniform(k1, (B, C, H, W), jnp.float32, 0.01, 0.99)
    target = jax.random.bernoulli(k2, 0.5, (B, C, H, W)).astype(jnp.float32)
    mask = jax.random.bernoulli(k3, 0.7, (B, C)).astype(jnp.float32)

    out = mask_bce_loss_sum(logits, target, mask)
    out = jax.block_until_ready(out)

    ref = _reference(logits, target, mask)
    assert jnp.allclose(out, ref, rtol=1e-5, atol=1e-5), (out, ref)

    print("KERNEL_OK")
</pallas_src>

<mosaic_0001>
module attributes {stable_mosaic.version = 11 : i64} {
  func.func @_mask_bce_rowsum_kernel(%arg0: i32, %arg1: i32, %arg2: memref<8x256xf32, #tpu.memory_space<vmem>>, %arg3: memref<8x256xf32, #tpu.memory_space<vmem>>, %arg4: memref<8x1xf32, #tpu.memory_space<vmem>>) attributes {dimension_semantics = [#tpu.dimension_semantics<parallel>, #tpu.dimension_semantics<arbitrary>], iteration_bounds = array<i64: 1, 1>, scalar_prefetch = 0 : i64, scratch_operands = 0 : i64, tpu.core_type = #tpu.core_type<tc>, window_params = [{transform_indices = @transform_0, window_bounds = array<i64: 8, 256>}, {transform_indices = @transform_1, window_bounds = array<i64: 8, 256>}, {transform_indices = @transform_2, window_bounds = array<i64: 8, 1>}]} {
    %c0_i32 = arith.constant 0 : i32
    %0 = arith.cmpi eq, %arg1, %c0_i32 : i32
    %1 = arith.extui %0 : i1 to i32
    %c0_i32_0 = arith.constant 0 : i32
    %2 = arith.cmpi ne, %1, %c0_i32_0 : i32
    scf.if %2 {
      %cst_12 = arith.constant 0.000000e+00 : f32
      %23 = vector.broadcast %cst_12 : f32 to vector<8x1xf32>
      %c0_13 = arith.constant 0 : index
      %c0_14 = arith.constant 0 : index
      %24 = vector.load %arg4[%c0_13, %c0_14] : memref<8x1xf32, #tpu.memory_space<vmem>>, vector<8x1xf32>
      tpu.vector_store %arg4[%c0_13, %c0_14], %23 {strides = array<i32>} : memref<8x1xf32, #tpu.memory_space<vmem>>, vector<8x1xf32>,
    } else {
    }
    %c0 = arith.constant 0 : index
    %c0_1 = arith.constant 0 : index
    %3 = vector.load %arg2[%c0, %c0_1] : memref<8x256xf32, #tpu.memory_space<vmem>>, vector<8x256xf32>
    %c0_2 = arith.constant 0 : index
    %c0_3 = arith.constant 0 : index
    %4 = vector.load %arg3[%c0_2, %c0_3] : memref<8x256xf32, #tpu.memory_space<vmem>>, vector<8x256xf32>
    %cst = arith.constant 9.99999997E-7 : f32
    %5 = vector.broadcast %cst : f32 to vector<8x256xf32>
    %6 = arith.addf %3, %5 : vector<8x256xf32>
    %7 = math.log %6 : vector<8x256xf32>
    %8 = arith.mulf %4, %7 : vector<8x256xf32>
    %cst_4 = arith.constant 1.000000e+00 : f32
    %9 = vector.broadcast %cst_4 : f32 to vector<8x256xf32>
    %10 = arith.subf %9, %4 : vector<8x256xf32>
    %cst_5 = arith.constant 1.000000e+00 : f32
    %11 = vector.broadcast %cst_5 : f32 to vector<8x256xf32>
    %12 = arith.subf %11, %3 : vector<8x256xf32>
    %cst_6 = arith.constant 9.99999997E-7 : f32
    %13 = vector.broadcast %cst_6 : f32 to vector<8x256xf32>
    %14 = arith.subf %12, %13 : vector<8x256xf32>
    %15 = math.log %14 : vector<8x256xf32>
    %16 = arith.mulf %10, %15 : vector<8x256xf32>
    %17 = arith.addf %8, %16 : vector<8x256xf32>
    %c0_7 = arith.constant 0 : index
    %c0_8 = arith.constant 0 : index
    %18 = vector.load %arg4[%c0_7, %c0_8] : memref<8x1xf32, #tpu.memory_space<vmem>>, vector<8x1xf32>
    %cst_9 = arith.constant dense<0.000000e+00> : vector<8xf32>
    %19 = vector.multi_reduction <add>, %17, %cst_9 [1] : vector<8x256xf32> to vector<8xf32>
    %20 = vector.shape_cast %19 : vector<8xf32> to vector<8x1xf32>
    %21 = arith.addf %18, %20 : vector<8x1xf32>
    %c0_10 = arith.constant 0 : index
    %c0_11 = arith.constant 0 : index
    %22 = vector.load %arg4[%c0_10, %c0_11] : memref<8x1xf32, #tpu.memory_space<vmem>>, vector<8x1xf32>
    tpu.vector_store %arg4[%c0_10, %c0_11], %21 {strides = array<i32>} : memref<8x1xf32, #tpu.memory_space<vmem>>, vector<8x1xf32>,
    return
  }
  func.func @transform_0(%arg0: i32, %arg1: i32) -> (i32, i32) {
    %c0_i32 = arith.constant 0 : i32
    return %arg0, %arg1 : i32, i32
  }
  func.func @transform_1(%arg0: i32, %arg1: i32) -> (i32, i32) {
    %c0_i32 = arith.constant 0 : i32
    return %arg0, %arg1 : i32, i32
  }
  func.func @transform_2(%arg0: i32, %arg1: i32) -> (i32, i32) {
    %c0_i32 = arith.constant 0 : i32
    %c0_i32_0 = arith.constant 0 : i32
    return %arg0, %c0_i32 : i32, i32
  }
}

</mosaic_0001>

<bundles_post_ra>
// kernel: mask_bce_loss_sum.1
= control target key start
LH: loop header
LB: loop body
LE: loop exit
PB: predicated region body
PF: predicated region fallthrough
CT: control target
= control target key end

     0   :  { %vm15_vm0 = vcmask 7168   ;;  %v65_v2 = vmov 0.0   ;;  %s104_s0 = inlined_call_operand.vmem [shape: f32[8,256], index: 0, kind: input, shape index: {}]   ;;  %s105_s2 = inlined_call_operand.vmem [shape: f32[8,1], index: 2, kind: output, shape index: {}]   ;;  %s106_s1 = inlined_call_operand.vmem [shape: f32[8,256], index: 1, kind: input, shape index: {}]  }
   0x1   :  { %v17_v0 = vld [vmem:[%s104_s0] sm:$0xff]  ;;  %v18_v1 = vld [vmem:[%s104_s0 + $0x8] sm:$0xff]  ;;  %16 = vst.msk [vmem:[%s105_s2] sm:$0xff] %vm15_vm0, %v65_v2 }
   0x2   :  { %v21_v3 = vadd.f32 1e-06, %v17_v0  ;;  %v22_v4 = vadd.f32 1e-06, %v18_v1  ;;  %v31_v5 = vsub.f32 1.0, %v17_v0  ;;  %v32_v6 = vsub.f32 1.0, %v18_v1 }
   0x3   :  { %v19_v9 = vld [vmem:[%s106_s1] sm:$0xff]  ;;  %v20_v11 = vld [vmem:[%s106_s1 + $0x8] sm:$0xff] }
   0x4   :  { %57 = vlog2.f32 %v21_v3  ;;  %v54_v7 = vadd.f32 -1e-06, %v31_v5  ;;  %v55_v8 = vadd.f32 -1e-06, %v32_v6  ;;  %v29_v15 = vsub.f32 1.0, %v19_v9 }
   0x5   :  { %59 = vlog2.f32 %v22_v4  ;;  %v30_v17 = vsub.f32 1.0, %v20_v11 }
   0x6   :  { %61 = vlog2.f32 %v54_v7 }
   0x7   :  { %63 = vlog2.f32 %v55_v8 }
   0x8   :  { %v43_v28 = vld [vmem:[%s105_s2] sm:$0xff] }
   0xe   :  { %v58_v10 = vpop.eup %57 }
   0xf   :  { %v60_v12 = vpop.eup %59  ;;  %v24_v13 = vmul.f32 0.6931472, %v58_v10 }
  0x10   :  { %v26_v14 = vmul.f32 0.6931472, %v60_v12  ;;  %v62_v16 = vpop.eup %61 }
  0x11   :  { %v64_v18 = vpop.eup %63  ;;  %v27_v19 = vmul.f32 %v24_v13, %v19_v9  ;;  %v36_v20 = vmul.f32 0.6931472, %v62_v16 }
  0x12   :  { %v28_v21 = vmul.f32 %v26_v14, %v20_v11  ;;  %v38_v22 = vmul.f32 0.6931472, %v64_v18 }
  0x13   :  { %v39_v23 = vmul.f32 %v36_v20, %v29_v15 }
  0x14   :  { %v40_v24 = vmul.f32 %v38_v22, %v30_v17 }
  0x15   :  { %v41_v25 = vadd.f32 %v39_v23, %v27_v19 }
  0x16   :  { %v42_v26 = vadd.f32 %v40_v24, %v28_v21 }
  0x18   :  { %v44_v27 = vadd.f32 %v42_v26, %v41_v25 }
  0x1a   :  { %45 = vadd.xlane.f32.xlu0 %v44_v27 }
  0xa7   :  { %v46_v29 = vpop.xlane.xlu0 %45 }
  0xa8   :  { %v47_v30 = vadd.f32 %v46_v29, %v43_v28 }
  0xaa   :  { %49 = vst.msk [vmem:[%s105_s2] sm:$0xff] %vm15_vm0, %v47_v30 }

</bundles_post_ra>
